<compile_context>
chip_gen: v5e
topology: v5e:2x2
jax: 0.10.0
libtpu: 0.0.40
codegen_flags: <defaults>
</compile_context>

<pallas_src>
import functools

import jax
import jax.numpy as jnp
from jax.experimental import pallas as pl
from jax.experimental.pallas import tpu as pltpu


def _conv_matmul_kernel(w_ref, p_ref, o_ref, *, apply_relu):
    # w_ref: (Co, K_pad) bf16   p_ref: (K_pad, NT) bf16   o_ref: (Co, NT) out dtype
    acc = jnp.dot(w_ref[...], p_ref[...], preferred_element_type=jnp.float32)
    if apply_relu:
        acc = jnp.maximum(acc, 0.0)
    o_ref[...] = acc.astype(o_ref.dtype)


def vi_conv2d_pallas(x, w5, b=None, *, pad=None, stride=1, relu=False,
                     compute_dtype=jnp.bfloat16, lane_tile=512):
    """x: (B,S,C_in,H,W) or (B,C_in,H,W); w5: (S,C_out,C_in,KH,KW); b: (S,C_out) or None."""
    if x.ndim == 4:                                     # mirror torch: x.unsqueeze(dim=1)
        x = x[:, None]
    out_dtype = x.dtype
    if pad is not None:
        x = jnp.pad(x, ((0, 0), (0, 0), (0, 0), (pad, pad), (pad, pad)))
    B, Sx, Ci, H, W = x.shape
    S, Co, Ci2, KH, KW = w5.shape
    assert Ci2 == Ci and (Sx == S or Sx == 1)
    Ho = (H - KH) // stride + 1
    Wo = (W - KW) // stride + 1
    N = Ho * Wo
    K0 = Ci * KH * KW

    # --- im2col in the wrapper (layout plumbing; the contraction stays in the kernel) ---
    taps = []
    for n in range(KH):
        for o in range(KW):
            taps.append(x[:, :, :,
                          n:n + (Ho - 1) * stride + 1:stride,
                          o:o + (Wo - 1) * stride + 1:stride])
    pats = jnp.stack(taps, axis=3)                      # (B, Sx, Ci, KH*KW, Ho, Wo)
    pats = pats.reshape(B, Sx, K0, N)                   # K ordering (ci, kh, kw) matches w
    w_flat = w5.reshape(S, Co, K0)

    # fold bias into the matmul as one extra K row of ones
    if b is not None:
        pats = jnp.concatenate([pats, jnp.ones((B, Sx, 1, N), pats.dtype)], axis=2)
        w_flat = jnp.concatenate([w_flat, b[:, :, None].astype(w_flat.dtype)], axis=2)
    K = pats.shape[2]

    # stream the big operands in bf16; the kernel accumulates in f32 on the MXU
    pats = pats.astype(compute_dtype)
    w_flat = w_flat.astype(compute_dtype)
    dsize = jnp.dtype(compute_dtype).itemsize
    osize = jnp.dtype(out_dtype).itemsize

    # padding: K -> packing multiple (16 for bf16), N -> multiple of the lane tile
    k_mult = 8 * (4 // dsize)
    K_pad = -(-K // k_mult) * k_mult
    lane_tile = max(128, (lane_tile // 128) * 128)
    NT = min(lane_tile, -(-N // 128) * 128)             # lane tile (multiple of 128)
    N_pad = -(-N // NT) * NT
    n_tiles = N_pad // NT
    pats = jnp.pad(pats, ((0, 0), (0, 0), (0, K_pad - K), (0, N_pad - N)))
    w_flat = jnp.pad(w_flat, ((0, 0), (0, 0), (0, K_pad - K)))

    # patch index map in natural (B, Sx, K_pad, N_pad) layout; if one shared input batch
    # is broadcast across S weight draws (torch x.unsqueeze(1) path), pin the S index to 0.
    if Sx == S:
        p_index = lambda s, bi, ni: (bi, s, 0, ni)
    else:
        p_index = lambda s, bi, ni: (bi, 0, 0, ni)

    w_bytes = Co * K_pad * dsize
    p_bytes = K_pad * NT * dsize
    o_bytes = Co * NT * osize
    vmem_limit = int(min(max(3 * (w_bytes + p_bytes + o_bytes) + (4 << 20), 32 << 20),
                         64 << 20))
    cost = pl.CostEstimate(
        flops=2 * S * B * Co * K_pad * N_pad,
        transcendentals=0,
        bytes_accessed=(S * B * K_pad * N_pad * dsize
                        + S * Co * K_pad * dsize
                        + S * B * Co * N_pad * osize))

    kernel = functools.partial(_conv_matmul_kernel, apply_relu=relu)
    out = pl.pallas_call(
        kernel,
        out_shape=jax.ShapeDtypeStruct((B, S, Co, N_pad), out_dtype),
        grid_spec=pltpu.PrefetchScalarGridSpec(
            num_scalar_prefetch=0,
            grid=(S, B, n_tiles),                       # lane tiles innermost -> one
            in_specs=[                                  # weight DMA per VI sample
                pl.BlockSpec((None, Co, K_pad), lambda s, bi, ni: (s, 0, 0)),
                pl.BlockSpec((None, None, K_pad, NT), p_index),
            ],
            out_specs=pl.BlockSpec((None, None, Co, NT),
                                   lambda s, bi, ni: (bi, s, 0, ni)),
        ),
        compiler_params=pltpu.CompilerParams(
            dimension_semantics=("parallel", "parallel", "parallel"),
            vmem_limit_bytes=vmem_limit),
        cost_estimate=cost,
    )(w_flat, pats)

    # un-pad / un-fold (output already produced in (B, S, Co, N_pad) layout)
    return out[:, :, :, :N].reshape(B, S, Co, Ho, Wo)


def _softplus(r):
    return jnp.log1p(jnp.exp(r))


def non_fac_conv_forward(x, w_mu, w_rho, eps_w, b_mu=None, b_rho=None, eps_b=None,
                         *, pad=None, stride=1, relu=False):
    """Mirrors non_fac_conv.forward with default config (bn=False, PreAc=False)."""
    w = w_mu[None] + _softplus(w_rho)[None] * eps_w          # (S, C_out, C_in, KH, KW)
    b = None
    if b_mu is not None:
        b = b_mu[None] + _softplus(b_rho)[None] * eps_b      # (S, C_out)
    return vi_conv2d_pallas(x, w, b, pad=pad, stride=stride, relu=relu)


def vi_conv2d_ref(x, w5, b=None, *, pad=None, stride=1, relu=False):
    """Pure-JAX reference mirroring the torch forward (unfold + einsum)."""
    if x.ndim == 4:
        x = x[:, None]
    S = w5.shape[0]
    if x.shape[1] == 1 and S > 1:
        x = jnp.broadcast_to(x, (x.shape[0], S) + x.shape[2:])
    if pad is not None:
        x = jnp.pad(x, ((0, 0), (0, 0), (0, 0), (pad, pad), (pad, pad)))
    B, _, Ci, H, W = x.shape
    _, Co, _, KH, KW = w5.shape
    Ho = (H - KH) // stride + 1
    Wo = (W - KW) // stride + 1
    pats = jnp.stack(
        [jnp.stack([x[:, :, :,
                      n:n + (Ho - 1) * stride + 1:stride,
                      o:o + (Wo - 1) * stride + 1:stride] for o in range(KW)], axis=-1)
         for n in range(KH)], axis=-2)                       # (B,S,Ci,Ho,Wo,KH,KW)
    out = jnp.einsum('ijklmno,jpkno->ijplm', pats, w5,
                     precision=jax.lax.Precision.HIGHEST)
    if b is not None:
        out = out + b[None, :, :, None, None]
    if relu:
        out = jnp.maximum(out, 0.0)
    return out


if __name__ == "__main__":
    key = jax.random.PRNGKey(0)
    k1, k2, k3, k4, k5, k6, k7 = jax.random.split(key, 7)

    B, S = 2, 3
    C_in, C_out, KH, KW = 4, 8, 3, 3
    H = W = 16

    # deterministic synthetic inputs / variational parameters / noise draws
    x = jax.random.normal(k1, (B, S, C_in, H, W), dtype=jnp.float32)
    w_mu = jax.random.normal(k2, (C_out, C_in, KH, KW), dtype=jnp.float32) * 0.1
    w_rho = jax.random.normal(k3, (C_out, C_in, KH, KW), dtype=jnp.float32) * 0.5 - 4.0
    eps_w = jax.random.normal(k4, (S, C_out, C_in, KH, KW), dtype=jnp.float32)
    b_mu = jax.random.normal(k5, (C_out,), dtype=jnp.float32) * 0.1
    b_rho = jax.random.normal(k6, (C_out,), dtype=jnp.float32) * 0.5 - 4.0
    eps_b = jax.random.normal(k7, (S, C_out), dtype=jnp.float32)

    w5 = w_mu[None] + _softplus(w_rho)[None] * eps_w
    b = b_mu[None] + _softplus(b_rho)[None] * eps_b

    def _m(a):  # bf16-matched values (what the kernel actually streams), f32 arithmetic
        return a.astype(jnp.bfloat16).astype(jnp.float32)

    # 1) (B, S, ...) input, relu=False
    out = jax.block_until_ready(
        non_fac_conv_forward(x, w_mu, w_rho, eps_w, b_mu, b_rho, eps_b))
    assert out.shape == (B, S, C_out, H - KH + 1, W - KW + 1)
    ref_match = vi_conv2d_ref(_m(x), _m(w5), _m(b))
    assert jnp.allclose(out, ref_match, atol=2e-3, rtol=2e-3), "mismatch vs bf16-matched ref"
    ref_f32 = vi_conv2d_ref(x, w5, b)
    assert jnp.allclose(out, ref_f32, atol=4e-2, rtol=4e-2), "mismatch vs f32 ref"

    # 2) fused ReLU epilogue
    out_r = jax.block_until_ready(
        non_fac_conv_forward(x, w_mu, w_rho, eps_w, b_mu, b_rho, eps_b, relu=True))
    assert jnp.allclose(out_r, vi_conv2d_ref(_m(x), _m(w5), _m(b), relu=True),
                        atol=2e-3, rtol=2e-3), "mismatch (relu)"

    # 3) 4-D input broadcast across the S weight samples (torch x.unsqueeze(1) path)
    x4 = x[:, 0]
    out4 = jax.block_until_ready(
        non_fac_conv_forward(x4, w_mu, w_rho, eps_w, b_mu, b_rho, eps_b))
    assert out4.shape == (B, S, C_out, H - KH + 1, W - KW + 1)
    assert jnp.allclose(out4, vi_conv2d_ref(_m(x4), _m(w5), _m(b)),
                        atol=2e-3, rtol=2e-3), "mismatch (4-D broadcast)"

    print("KERNEL_OK")
</pallas_src>

<mosaic_0001>
module attributes {stable_mosaic.version = 11 : i64} {
  func.func @_conv_matmul_kernel(%arg0: i32, %arg1: i32, %arg2: i32, %arg3: memref<1x8x48xbf16, #tpu.memory_space<vmem>>, %arg4: memref<1x1x48x256xbf16, #tpu.memory_space<vmem>>, %arg5: memref<1x1x8x256xf32, #tpu.memory_space<vmem>>) attributes {dimension_semantics = [#tpu.dimension_semantics<parallel>, #tpu.dimension_semantics<parallel>, #tpu.dimension_semantics<parallel>], iteration_bounds = array<i64: 3, 2, 1>, scalar_prefetch = 0 : i64, scratch_operands = 0 : i64, tpu.core_type = #tpu.core_type<tc>, window_params = [{transform_indices = @transform_0, window_bounds = array<i64: 1, 8, 48>}, {transform_indices = @transform_1, window_bounds = array<i64: 1, 1, 48, 256>}, {transform_indices = @transform_2, window_bounds = array<i64: 1, 1, 8, 256>}]} {
    %c0 = arith.constant 0 : index
    %c0_0 = arith.constant 0 : index
    %c0_1 = arith.constant 0 : index
    %0 = vector.load %arg3[%c0, %c0_0, %c0_1] : memref<1x8x48xbf16, #tpu.memory_space<vmem>>, vector<1x8x48xbf16>
    %1 = vector.shape_cast %0 : vector<1x8x48xbf16> to vector<8x48xbf16>
    %c0_2 = arith.constant 0 : index
    %c0_3 = arith.constant 0 : index
    %c0_4 = arith.constant 0 : index
    %c0_5 = arith.constant 0 : index
    %2 = vector.load %arg4[%c0_2, %c0_3, %c0_4, %c0_5] : memref<1x1x48x256xbf16, #tpu.memory_space<vmem>>, vector<1x1x48x256xbf16>
    %3 = vector.shape_cast %2 : vector<1x1x48x256xbf16> to vector<48x256xbf16>
    %cst = arith.constant dense<0.000000e+00> : vector<8x256xf32>
    %4 = tpu.matmul %1, %3, %cst {dimension_numbers = #tpu.dot_dimension_numbers<[1], [0], [0], [1], [0, 0, 1, 1], [], []>} : vector<8x48xbf16>, vector<48x256xbf16>, vector<8x256xf32> -> vector<8x256xf32>
    %c0_6 = arith.constant 0 : index
    %c0_7 = arith.constant 0 : index
    %c0_8 = arith.constant 0 : index
    %c0_9 = arith.constant 0 : index
    %5 = vector.load %arg5[%c0_6, %c0_7, %c0_8, %c0_9] : memref<1x1x8x256xf32, #tpu.memory_space<vmem>>, vector<1x1x8x256xf32>
    %6 = vector.shape_cast %5 : vector<1x1x8x256xf32> to vector<8x256xf32>
    %7 = vector.shape_cast %4 : vector<8x256xf32> to vector<1x1x8x256xf32>
    tpu.vector_store %arg5[%c0_6, %c0_7, %c0_8, %c0_9], %7 {strides = array<i32>} : memref<1x1x8x256xf32, #tpu.memory_space<vmem>>, vector<1x1x8x256xf32>,
    return
  }
  func.func @transform_0(%arg0: i32, %arg1: i32, %arg2: i32) -> (i32, i32, i32) {
    %c0_i32 = arith.constant 0 : i32
    %c0_i32_0 = arith.constant 0 : i32
    %c0_i32_1 = arith.constant 0 : i32
    return %arg0, %c0_i32, %c0_i32_0 : i32, i32, i32
  }
  func.func @transform_1(%arg0: i32, %arg1: i32, %arg2: i32) -> (i32, i32, i32, i32) {
    %c0_i32 = arith.constant 0 : i32
    %c0_i32_0 = arith.constant 0 : i32
    return %arg1, %arg0, %c0_i32, %arg2 : i32, i32, i32, i32
  }
  func.func @transform_2(%arg0: i32, %arg1: i32, %arg2: i32) -> (i32, i32, i32, i32) {
    %c0_i32 = arith.constant 0 : i32
    %c0_i32_0 = arith.constant 0 : i32
    return %arg1, %arg0, %c0_i32, %arg2 : i32, i32, i32, i32
  }
}

</mosaic_0001>

<bundles_post_ra>
// kernel: tpu_custom_call.1
= control target key start
LH: loop header
LB: loop body
LE: loop exit
PB: predicated region body
PF: predicated region fallthrough
CT: control target
= control target key end

     0   :  { %s1031_s0 = inlined_call_operand.hbm [shape: bf16[3,8,48], index: 0, kind: input, shape index: {}]   ;;  %s1032_s1 = inlined_call_operand.hbm [shape: bf16[2,3,48,256], index: 1, kind: input, shape index: {}]   ;;  %s1033_s2 = inlined_call_operand.hbm [shape: f32[2,3,8,256], index: 2, kind: output, shape index: {}]  }
   0x1   :  { %1038 = sst [smem:[#allocation17_spill]] %s1031_s0 }
   0x2   :  { %7 = vsyncpa [#allocation3], 0 }
   0x3   :  { %9 = vsyncpa [#allocation3 + $0x1], 0 }
   0x4   :  { %10 = vsyncpa [#allocation6], 0 }
   0x5   :  { %12 = vsyncpa [#allocation6 + $0x1], 0 }
   0x6   :  { %13 = vsyncpa [#allocation4], 0 }
   0x7   :  { %15 = vsyncpa [#allocation4 + $0x1], 0  ;;  %s810_s9 = smov 0   ;;  %s812_s10 = smov 0  }
   0x8   :  { %s814_s11 = smov 0   ;;  %s816_s12 = smov 0  }
   0x9   :  { %s818_s13 = smov 0   ;;  %s820_s14 = smov 0  }
   0xa   :  { %s822_s15 = smov 0   ;;  %s824_s16 = smov 0  }
   0xb   :  { %s826_s17 = smov 0   ;;  %s828_s18 = smov 0  }
   0xc   :  { %s830_s19 = smov 0  }
   0xd LB: > { %1039 = sst [smem:[#allocation11_spill]] %s771_s14  ;;  %s444_s20 = sadd.s32 4294967295, %s791_s19   ;;  %s791_s19 = sphi %s830_s19, %s21_s19   ;;  %s787_s18 = sphi %s828_s18, %s1069_s18   ;;  %s783_s17 = sphi %s826_s17, %s1068_s17   ;;  %s779_s16 = sphi %s824_s16, %s1067_s16   ;;  %s775_s15 = sphi %s822_s15, %s1066_s15   ;;  %s771_s14 = sphi %s820_s14, %s1058_s14   ;;  %s767_s13 = sphi %s818_s13, %s1065_s13   ;;  %s763_s12 = sphi %s816_s12, %s1064_s12   ;;  %s759_s11 = sphi %s814_s11, %s1063_s11   ;;  %s755_s10 = sphi %s812_s10, %s1062_s10   ;;  %s751_s9 = sphi %s810_s9, %s1061_s9  }
   0xe   : > { %s445_s21 = sadd.s32 4294967294, %s791_s19   ;;  %s36_s22 = sadd.s32 1, %s783_s17 }
   0xf   : > { %s40_s23 = sadd.s32 1, %s787_s18  ;;  %p38_p0 = scmp.ge.s32.totalorder %s36_s22, 2 }
  0x10   : > { %s47_s24 = sadd.s32 1, %s771_s14  ;;  %p54_p1 = scmp.ne.s32.totalorder %s771_s14, %s767_s13 }
  0x11   : > { %p55_p2 = scmp.eq.s32.totalorder %s791_s19, 0  ;;  %s1071_s22 = smov (%p38_p0, %s36_s22), 0 }
  0x12   : > { %1040 = sst [smem:[#allocation12_spill]] %s1071_s22  ;;  %s1073_s23 = smov (!%p38_p0, %s40_s23), %s787_s18 }
  0x13   : > { %p876_p3 = por %p55_p2, %p54_p1  ;;  %p60_p4 = scmp.ne.s32.totalorder %s767_s13, %s763_s12 }
  0x14   : > { %p42_p5 = scmp.ge.s32.totalorder %s1073_s23, 3  ;;  %p881_p6 = scmp.eq.s32.totalorder %s444_s20, 0 }
  0x15   : > { %s70_s27 = ssub.s32 %s783_s17, %s1071_s22  ;;  %s77_s28 = sadd.s32 1, %s759_s11 }
  0x16   : > { %s1075_s23 = smov (%p42_p5, %s1073_s23), 0  ;;  %p892_p7 = por %p881_p6, %p60_p4 }
  0x17   : > { %1043 = sst [smem:[#allocation13_spill]] %s1075_s23  ;;  %p84_p8 = scmp.ne.s32.totalorder %s759_s11, %s755_s10 }
  0x18   : > { %s44_s30 = ssub.s32 %s787_s18, %s1075_s23  ;;  %p90_p9 = scmp.ne.s32.totalorder %s755_s10, %s751_s9 }
  0x19   : > { %p45_p10 = scmp.eq.s32.totalorder %s44_s30, 0  ;;  %s72_s3 = sor.u32 %s70_s27, %s44_s30 }
  0x1a   : > { %p75_p11 = scmp.eq.s32.totalorder %s72_s3, 0  ;;  %p904_p12 = por %p84_p8, %p55_p2 }
  0x1b   : > { %s909_s5 = scalar_select %p45_p10, %s771_s14, %s47_s24  }
  0x1c   : > { %s912_s6 = scalar_select %p75_p11, %s759_s11, %s77_s28  }
  0x1d   : > { %1046 = sst [smem:[#allocation14_spill]] %s909_s5  ;;  %p916_p13 = por %p90_p9, %p881_p6 }
  0x1e   : > { %1047 = sst [smem:[#allocation15_spill]] %s912_s6  ;;  %p118_p0 = scmp.eq.s32.totalorder %s444_s20, 5 }
  0x1f   : > { %p124_p1 = scmp.eq.s32.totalorder %s445_s21, 5  ;;  %p513_p2 = scmp.lt.s32.totalorder %s791_s19, 6 }
  0x20   : > { %p920_p4 = por %p118_p0, %p84_p8  ;;  %s144_s24 = sand.u32 1, %s771_s14  }
  0x21   : > { %p925_p5 = por %p124_p1, %p90_p9  ;;  %s448_s26 = sshll.u32 %s144_s24, 2 }
  0x22   : > { %s449_s27 = sshll.u32 %s787_s18, 2  ;;  %s1052_s0 = sld [smem:[#allocation17_spill]] }
  0x23   : > { %s1050_s12 = scalar_select %p925_p5, 1, 0 }
  0x24   : > { %s148_s21 = scalar_lea.vmem [#allocation2], %s448_s26  ;;  %p503_p6 = pnand %p513_p2, %p876_p3 }
  0x25   : > { %1051 = sst [smem:[#allocation16_spill]] %s1050_s12  ;;  %s156_s3 = sshll.u32 %s148_s21, 4  ;;  %s157_s3 = int_to_ptr.vmem [resolvable:$true] %s156_s3 }
  0x26   : > { %p938_p8 = pnand %p513_p2, %p904_p12  ;;  %p451_p9 = scmp.ge.s32.totalorder %s791_s19, 1 }
  0x27   : > { %p187_p10 = scmp.lt.s32.totalorder %s791_s19, 7  ;;  %s145_s5 = scalar_lea.sflag [#allocation3], %s144_s24 }
  0x28   : > { %s152_s20 = scalar_lea.hbm %s1052_s0, %s449_s27  ;;  %s163_s26 = sand.u32 1, %s759_s11  }
  0x29   : > { %s154_s23 = sshll.u32 %s152_s20, 4  ;;  %p944_p11 = pnand %p451_p9, %p187_p10  ;;  %s155_s23 = int_to_ptr.hbm [resolvable:$true] %s154_s23 }
  0x2a   : > { %505 = dma.hbm_to_vmem [thread:$0]  (!%p503_p6), %s155_s23, 64, %s157_s3, %s145_s5  }
  0x2b   : > { %s492_s27 = smul.u32 12, %s787_s18  ;;  %s164_s23 = scalar_lea.sflag [#allocation6], %s163_s26 }
  0x2c   : > { %s491_s30 = smul.u32 48, %s163_s26  ;;  %s793_s5 = smov 128  }
  0x2d   : > { %s493_s20 = smul.u32 36, %s783_s17  ;;  %s794_s3 = smov 8  }
  0x2e   : > { %s167_s21 = scalar_lea.vmem [#allocation5], %s491_s30 }
  0x2f   : > { %s174_s25 = sadd.s32 %s493_s20, %s492_s27  ;;  %s179_s4 = sshll.u32 %s167_s21, 4  ;;  %s180_s4 = int_to_ptr.vmem [resolvable:$true] %s179_s4 }
  0x30   : > { %s450_s0 = sshll.u32 %s174_s25, 2  ;;  %191 = sbr.rel (%p944_p11) target bundleno = 208 (0xd0), region = 28 }
  0x31   : > { %s176_s12 = scalar_lea.hbm %s1032_s1, %s450_s0  ;;  %s193_s27 = sand.u32 (!%p944_p11), 1, %s767_s13  }
  0x32   : > { %s177_s24 = sshll.u32 %s176_s12, 4  ;;  %s959_s30 = sshll.u32 (!%p944_p11), %s193_s27, 2  ;;  %s178_s24 = int_to_ptr.hbm [resolvable:$true] %s177_s24 }
  0x33   : > { %508 = dma.hbm_to_vmem [thread:$0]  (!%p938_p8), %s178_s24, 768, %s180_s4, %s164_s23, %s793_s5, %s793_s5, %s794_s3  }
  0x34   : > { %s194_s20 = scalar_lea.sflag (!%p944_p11), [#allocation3], %s193_s27  ;;  %s197_s14 = scalar_lea.vmem (!%p944_p11), [#allocation2], %s959_s30 }
  0x35   : > { %738 = dma.done.wait (%p892_p7), %s194_s20, 64  }
  0x36   : > { %740 = vsyncadd (%p892_p7), %s194_s20, 4294967232  ;;  %s967_s0 = sand.u32 1, %s755_s10  }
  0x37   : > { %s494_s22 = smul.u32 48, %s967_s0  ;;  %s204_s6 = scalar_lea.sflag [#allocation6], %s967_s0 }
  0x39   : > { %s207_s12 = scalar_lea.vmem [#allocation5], %s494_s22 }
  0x3a   : > { %742 = dma.done.wait (%p916_p13), %s204_s6, 768  }
  0x3b   : > { %744 = vsyncadd (%p916_p13), %s204_s6, 4294966528  ;;  %v472_v0 = vld [vmem:[%s207_s12 + $0x20] sm:$0xf]  ;;  %v490_v1 = vld [vmem:[%s207_s12 + $0x24] sm:$0xf0]  ;;  %vm274_vm0 = vcmask 392192  }
  0x3c   : > { %v489_v2 = vld [vmem:[%s207_s12 + $0x24] sm:$0xf]  ;;  %v473_v3 = vor.u32 %v490_v1, %v472_v0  ;;  %v474_v4 = vld [vmem:[%s207_s12 + $0x28] sm:$0xf0]  ;;  %v464_v5 = vld [vmem:[%s207_s12 + $0x10] sm:$0xf] }
  0x3d   : > { %v488_v6 = vld [vmem:[%s207_s12 + $0x14] sm:$0xf0]  ;;  %v477_v7 = vor.u32 %v489_v2, %v474_v4  ;;  %v487_v8 = vld [vmem:[%s207_s12 + $0x14] sm:$0xf]  ;;  %v466_v9 = vld [vmem:[%s207_s12 + $0x18] sm:$0xf0] }
  0x3e   : > { %283 = vmatpush.bf16.msra.mxu0 %v473_v3  ;;  %v465_v10 = vor.u32 %v488_v6, %v464_v5  ;;  %v469_v11 = vor.u32 %v487_v8, %v466_v9  ;;  %v456_v12 = vld [vmem:[%s207_s12] sm:$0xf]  ;;  %v486_v13 = vld [vmem:[%s207_s12 + $0x4] sm:$0xf0]  ;;  %v485_v14 = vld [vmem:[%s207_s12 + $0x4] sm:$0xf] }
  0x3f   : > { %296 = vmatpush.bf16.msra.mxu1 %v477_v7  ;;  %v458_v15 = vld [vmem:[%s207_s12 + $0x8] sm:$0xf0]  ;;  %v457_v16 = vor.u32 %v486_v13, %v456_v12  ;;  %s495_s29 = smul.u32 6, %s775_s15  ;;  %s481_s7 = sshll.u32 %s779_s16, 1 }
  0x40   : > { %v461_v17 = vor.u32 %v485_v14, %v458_v15  ;;  %v237_v18 = vld [vmem:[%s197_s14] sm:$0xf]  ;;  %s453_s25 = sshll.u32 %s967_s0, 4  ;;  %s307_s27 = scalar_lea.sflag [#allocation4], %s967_s0 }
  0x41   : > { %s320_s28 = sadd.s32 %s495_s29, %s481_s7  ;;  %s233_s23 = scalar_lea.vmem [#allocation7], %s453_s25 }
  0x42   : > { %284 = vmatpush.bf16.msra.mxu0 %v465_v10  ;;  %s482_s26 = sshll.u32 %s320_s28, 3  ;;  %s324_s5 = sshll.u32 %s233_s23, 4  ;;  %s325_s5 = int_to_ptr.vmem [resolvable:$true] %s324_s5 }
  0x43   : > { %297 = vmatpush.bf16.msra.mxu1 %v469_v11  ;;  %s322_s24 = scalar_lea.hbm %s1033_s2, %s482_s26  ;;  %s685_s14 = scalar_lea.hbm %s1033_s2, 96 }
  0x44   : > { %s326_s3 = sshll.u32 %s322_s24, 4  ;;  %s327_s3 = int_to_ptr.hbm [resolvable:$true] %s326_s3 }
  0x45   : > { %s679_s15 = sshra.s32 %s327_s3, 4  ;;  %s680_s15 = int_to_ptr.hbm [resolvable:$true] %s679_s15 }
  0x46   : > { %285 = vmatpush.bf16.msra.mxu0 %v457_v16  ;;  %s681_s16 = scalar_lea.hbm %s680_s15, 16  ;;  %p686_p13 = scmp.lt.s32.totalorder %s680_s15, %s1033_s2 }
  0x47   : > { %298 = vmatpush.bf16.msra.mxu1 %v461_v17  ;;  %p682_p3 = scmp.ne.s32.totalorder %s680_s15, %s681_s16  ;;  %p687_p0 = scmp.lt.s32.totalorder %s685_s14, %s681_s16 }
  0x49   : > { %478 = vmatmul.msk.bf16.vlgmr.msra.gmra.mxu0 %vm274_vm0, %v237_v18  ;;  %p683_p7 = pnand %p682_p3, %p920_p4  ;;  %p688_p1 = por %p687_p0, %p686_p13 }
  0x4a   : > { %479 = vmatmul.msk.bf16.vlgmr.msra.gmra.mxu1 %vm274_vm0, %v237_v18 }
  0x4b   : > { %p684_p12 = pneg %p683_p7 }
  0x4d   : > { %p689_p2 = pnand %p688_p1, %p684_p12 }
  0xc6   : > { %v287_v19 = vpop.f32.mrf.mxu0 }
  0xc7   : > { %304 = vst [vmem:[%s233_s23] sm:$0xff] %v287_v19  ;;  %v300_v20 = vpop.f32.mrf.mxu1 }
  0xc8   : > { %305 = vst [vmem:[%s233_s23 + $0x8] sm:$0xff] %v300_v20 }
  0xc9   : > { %692 = shalt.err (!%p689_p2)
}
  0xca   : > { %500 = dma.vmem_to_hbm [thread:$0]  (%p920_p4), %s325_s5, 256, %s327_s3, %s307_s27  }
  0xce   : > { %v289_v21 = vpop.f32.mrf.mxu0 }
  0xcf   : > { %v302_v22 = vpop.f32.mrf.mxu1 }
  0xd0 PF: > { %p514_p6 = scmp.ge.s32.totalorder %s791_s19, 2  ;;  %s338_s12 = sand.u32 1, %s751_s9  }
  0xd1   : > { %s339_s29 = scalar_lea.sflag [#allocation4], %s338_s12 }
  0xd2   : > { %p510_p8 = pnand %p514_p6, %p925_p5 }
  0xd4   : > { %p511_p9 = pneg %p510_p8 }
  0xd6   : > { %746 = dma.done.wait (%p511_p9), %s339_s29, 256  }
  0xd7   : > { %748 = vsyncadd (%p511_p9), %s339_s29, 4294967040  ;;  %s21_s19 = sadd.s32 1, %s791_s19   ;;  %s1056_s8 = sld [smem:[#allocation15_spill]] }
  0xd8   : > { %p18_p10 = scmp.ge.s32.totalorder %s21_s19, 8   ;;  %s1057_s7 = sld [smem:[#allocation11_spill]] }
  0xd9   : > { %s1058_s14 = sld [smem:[#allocation14_spill]]  ;;  %s1061_s9 = smov %s755_s10 }
  0xda   : > { %s1059_s28 = sld [smem:[#allocation12_spill]]  ;;  %s1062_s10 = smov %s759_s11 }
  0xdb   : > { %s1060_s26 = sld [smem:[#allocation13_spill]]  ;;  %s1064_s12 = smov %s767_s13 }
  0xdc   : > { %s1066_s15 = smov %s783_s17  ;;  %s1067_s16 = smov %s787_s18 }
  0xdd   : > { %s1063_s11 = smov %s1056_s8  ;;  %20 = sbr.rel (!%p18_p10) target bundleno = 13 (0xd), region = 86 }
  0xde   : > { %s1065_s13 = smov %s1057_s7 }
  0xe0   : > { %s1068_s17 = smov %s1059_s28 }
  0xe1   : > { %s1069_s18 = smov %s1060_s26 }
  0xe2   :  { %345 = vsyncpa [#allocation3], 1 }
  0xe3   :  { %347 = vsyncpa [#allocation3 + $0x1], 1 }
  0xe4   :  { %348 = vsyncpa [#allocation6], 1 }
  0xe5   :  { %350 = vsyncpa [#allocation6 + $0x1], 1 }
  0xe6   :  { %351 = vsyncpa [#allocation4], 1 }
  0xe7   :  { %353 = vsyncpa [#allocation4 + $0x1], 1 }

</bundles_post_ra>
